<compile_context>
chip_gen: v7x
topology: tpu7x:2x2x1
jax: 0.10.0
libtpu: 0.0.40
codegen_flags: <defaults>
</compile_context>

<pallas_src>
import functools

import jax
import jax.numpy as jnp
from jax.experimental import pallas as pl
from jax.experimental.pallas import tpu as pltpu


_SMEM = pl.BlockSpec(memory_space=pltpu.MemorySpace.SMEM)


# ---------------------------------------------------------------------------
# Recommended per-step path: inline jnp FMA, fuses into the caller's graph.
# ---------------------------------------------------------------------------
def ema_step_fused(moving_average, mi_est, *, alpha=0.01):
    """(1,) f32 buffer, (1,) f32 mi_est -> updated (1,) f32 buffer (no grad)."""
    mi = jax.lax.stop_gradient(mi_est)
    return (1.0 - alpha) * moving_average + alpha * mi


# ---------------------------------------------------------------------------
# Single-step EMA buffer update as a Pallas kernel (in-place aliased buffer).
# ---------------------------------------------------------------------------
def _ema_step_kernel(alpha, ma_ref, mi_ref, ma_out_ref):
    # Pure scalar-unit FMA: ma <- (1 - alpha) * ma + alpha * mi.
    ma_out_ref[0] = (1.0 - alpha) * ma_ref[0] + alpha * mi_ref[0]


@functools.partial(jax.jit, static_argnames=("alpha",))
def ema_step(moving_average, mi_est, *, alpha=0.01):
    """moving_average, mi_est: shape-(1,) float32. Returns updated (1,) buffer."""
    kernel = functools.partial(_ema_step_kernel, float(alpha))
    return pl.pallas_call(
        kernel,
        out_shape=jax.ShapeDtypeStruct((1,), jnp.float32),
        in_specs=[_SMEM, _SMEM],
        out_specs=_SMEM,
        input_output_aliases={0: 0},  # update the EMA buffer in place
    )(moving_average, jax.lax.stop_gradient(mi_est))


# ---------------------------------------------------------------------------
# Batched EMA: a whole sequence of mi_est scalars in ONE pallas_call.
# The recurrence is carried as a scalar loop value; the per-step trajectory is
# written to SMEM.  Unroll is capped — the chain is latency-bound.
# ---------------------------------------------------------------------------
def _ema_seq_kernel(alpha, mi_seq_ref, ma0_ref, ma_hist_ref):
    n = mi_seq_ref.shape[0]

    def body(i, ma):
        ma_new = (1.0 - alpha) * ma + alpha * mi_seq_ref[i]
        ma_hist_ref[i] = ma_new
        return ma_new

    # Capped unroll: dependent scalar FMA chain — full unroll adds no
    # throughput, only instruction-stream bloat.
    jax.lax.fori_loop(0, n, body, ma0_ref[0], unroll=min(int(n), 8))
    # TODO(synk): for very large N (>=1e4) switch to a parallel-scan
    # formulation in lane-dense VMEM instead of the serial SMEM scalar loop.


@functools.partial(jax.jit, static_argnames=("alpha",))
def ema_sequence(mi_seq, moving_average, *, alpha=0.01):
    """mi_seq: (N,) f32, moving_average: (1,) f32. Returns (N,) EMA trajectory."""
    n = mi_seq.shape[0]
    kernel = functools.partial(_ema_seq_kernel, float(alpha))
    return pl.pallas_call(
        kernel,
        out_shape=jax.ShapeDtypeStruct((n,), jnp.float32),
        in_specs=[_SMEM, _SMEM],
        out_specs=_SMEM,
    )(jax.lax.stop_gradient(mi_seq), moving_average)


class EMALoss:
    """Stateful wrapper mirroring the PyTorch nn.Module.

    forward(mi_est) -> mi_est (identity, differentiable exactly like PyTorch);
    the moving_average buffer is updated with no gradient path.

    Per-call default uses the fused inline-jnp update (review: the per-step
    work is a 2-flop FMA; a pallas_call boundary is 100-1000x the compute).
    `use_pallas=True` routes the per-step update through the Pallas kernel.
    `update_sequence` amortizes many steps through one batched pallas_call and
    keeps the buffer consistent by taking ma_hist[-1].
    """

    def __init__(self, alpha=0.01, use_pallas=False):
        self.alpha = float(alpha)
        self.use_pallas = bool(use_pallas)
        # register_buffer('moving_average', torch.tensor(0.0))
        self.moving_average = jnp.zeros((1,), jnp.float32)

    def __call__(self, mi_est):
        if self.use_pallas:
            self.moving_average = ema_step(
                self.moving_average, mi_est, alpha=self.alpha
            )
        else:
            self.moving_average = ema_step_fused(
                self.moving_average, mi_est, alpha=self.alpha
            )
        return mi_est  # forward value is the untouched input

    def update_sequence(self, mi_seq):
        """Process N mi_est scalars in one pallas_call; returns (N,) history."""
        ma_hist = ema_sequence(mi_seq, self.moving_average, alpha=self.alpha)
        # Keep the stateful buffer consistent with the per-step path.
        self.moving_average = ma_hist[-1:]
        return ma_hist


if __name__ == "__main__":
    key = jax.random.PRNGKey(0)
    n_steps = 8
    mi_estimates = jax.random.normal(key, (n_steps,), dtype=jnp.float32)

    alpha = 0.01

    # Pure-JAX reference EMA trajectory.
    ref_ma = jnp.float32(0.0)
    ref_hist = []
    for i in range(n_steps):
        ref_ma = (1.0 - alpha) * ref_ma + alpha * mi_estimates[i]
        ref_hist.append(ref_ma)
    ref_hist = jnp.stack(ref_hist)

    ok = True

    # --- per-step Pallas kernel path (one launch per forward call) ----------
    module_pallas = EMALoss(alpha=alpha, use_pallas=True)
    for i in range(n_steps):
        mi = mi_estimates[i : i + 1]          # (1,) f32 — no per-call convert
        out = module_pallas(mi)               # forward pass-through
        if not jnp.allclose(out, mi):
            ok = False
    per_step_ma = jax.block_until_ready(module_pallas.moving_average)
    if not jnp.allclose(per_step_ma[0], ref_hist[-1], atol=1e-6):
        ok = False

    # --- per-step fused-jnp path (recommended default) ----------------------
    module_fused = EMALoss(alpha=alpha, use_pallas=False)
    for i in range(n_steps):
        mi = mi_estimates[i : i + 1]
        out = module_fused(mi)
        if not jnp.allclose(out, mi):
            ok = False
    fused_ma = jax.block_until_ready(module_fused.moving_average)
    if not jnp.allclose(fused_ma[0], ref_hist[-1], atol=1e-6):
        ok = False

    # --- batched path: whole sequence in a single pallas_call ---------------
    module_batched = EMALoss(alpha=alpha)
    ma_hist = jax.block_until_ready(module_batched.update_sequence(mi_estimates))
    batched_ma = jax.block_until_ready(module_batched.moving_average)

    if not jnp.allclose(ma_hist, ref_hist, atol=1e-6):
        ok = False
    if not jnp.allclose(batched_ma[0], ref_hist[-1], atol=1e-6):
        ok = False
    if not jnp.allclose(batched_ma[0], per_step_ma[0], atol=1e-6):
        ok = False

    print("KERNEL_OK" if ok else "KERNEL_MISMATCH")
</pallas_src>

<mosaic_0001>
module attributes {stable_mosaic.version = 11 : i64} {
  func.func @_ema_step_kernel(%arg0: memref<1xf32, #tpu.memory_space<smem>>, %arg1: memref<1xf32, #tpu.memory_space<smem>>, %arg2: memref<1xf32, #tpu.memory_space<smem>>) attributes {dimension_semantics = [], scalar_prefetch = 0 : i64, scratch_operands = 0 : i64, tpu.core_type = #tpu.core_type<tc>} {
    %c0 = arith.constant 0 : index
    %0 = memref.load %arg0[%c0] : memref<1xf32, #tpu.memory_space<smem>>
    %cst = arith.constant 9.900000e-01 : f32
    %1 = arith.mulf %cst, %0 : f32
    %c0_0 = arith.constant 0 : index
    %2 = memref.load %arg1[%c0_0] : memref<1xf32, #tpu.memory_space<smem>>
    %cst_1 = arith.constant 0.00999999977 : f32
    %3 = arith.mulf %cst_1, %2 : f32
    %4 = arith.addf %1, %3 : f32
    %c0_2 = arith.constant 0 : index
    %5 = memref.load %arg2[%c0_2] : memref<1xf32, #tpu.memory_space<smem>>
    memref.store %4, %arg2[%c0_2] : memref<1xf32, #tpu.memory_space<smem>>
    return
  }
}

</mosaic_0001>

<bundles_post_ra>
// kernel: ema_step.1
= control target key start
LH: loop header
LB: loop body
LE: loop exit
PB: predicated region body
PF: predicated region fallthrough
CT: control target
= control target key end

     0   :  { %9 = vsyncpa [#allocation5], 0  ;;  %s81_s0 = inlined_call_operand.<no memory space> [shape: f32[1], index: 0, kind: input, shape index: {}, may-alias: {0,2}]   ;;  %s82_s1 = inlined_call_operand.<no memory space> [shape: f32[1], index: 1, kind: input, shape index: {}]   ;;  %s83_s2 = inlined_call_operand.hbm [shape: f32[1], index: 2, kind: output, shape index: {}, may-alias: {0,2}]  }
   0x1   :  { %s15_s11 = smul.f32 0.99, %s81_s0  ;;  %s35_s18 = scalar_lea.hbm %s83_s2, 16 }
   0x2   :  { %s17_s14 = smul.f32 0.01, %s82_s1  ;;  %p36_p0 = scmp.ne.s32.totalorder %s83_s2, %s35_s18 }
   0x3   :  { %p39_p1 = scmp.lt.u32.totalorder %s35_s18, %s83_s2 }
   0x4   :  { %s18_s15 = sadd.f32 %s17_s14, %s15_s11 }
   0x5   :  { %p41_p2 = pnand %p39_p1, %p36_p0 }
   0x6   :  { %20 = sst [smem:[#allocation4]] %s18_s15 }
   0x7   :  { %44 = shalt.err (!%p41_p2)
}
   0x8   :  { %s47_s0 = smov [#allocation4]  }
   0x9   :  { %28 = dma.smem_to_hbm %s47_s0, 16, %s83_s2, [#allocation5]  }
   0xa   :  { %45 = dma.done.wait [#allocation5], 16  }
   0xb   :  { %46 = vsyncadd [#allocation5], 4294967280 }
   0xc   :  { %32 = sfence }
   0xd   :  { %33 = vsyncpa [#allocation5], 1 }

</bundles_post_ra>
